<compile_context>
chip_gen: v6e
topology: v6e:2x2x1
jax: 0.10.0
libtpu: 0.0.40
codegen_flags: <defaults>
</compile_context>

<pallas_src>
import jax
import jax.numpy as jnp
from jax.experimental import pallas as pl
from jax.experimental.pallas import tpu as pltpu


def _layerscale_kernel(gamma_ref, x_ref, o_ref):
    # gamma_ref: (1, lanes) block, same block index every grid step -> stays
    # VMEM-resident (no re-DMA).  x_ref / o_ref: (tile_m, lanes) blocks.
    # Pure VPU elementwise multiply; multiply in gamma's (promoted) precision,
    # cast only the result.  The sublane broadcast of gamma is free-ish filler
    # under the HBM-bound roofline.
    o_ref[...] = (x_ref[...] * gamma_ref[...]).astype(o_ref.dtype)


def _choose_tile_rows(m_rows: int, lanes: int, itemsize: int) -> int:
    # Target ~2 MiB per x tile: with double-buffered input + output tiles the
    # live VMEM stays ~8-10 MiB, safely under the scoped limit on every
    # generation (v5e 16 MiB default, v6e/v7x 32 MiB) while large enough to
    # amortize the ~0.35 us per-grid-step overhead (~85% of HBM roofline).
    target_bytes = 2 * 1024 * 1024
    tile = max(1, target_bytes // max(1, lanes * itemsize))
    if tile >= m_rows:
        return m_rows  # single block along rows (== full array dim, legal)
    # Sublane alignment by dtype packing: f32 -> 8, bf16/f16 -> 16, int8 -> 32.
    align = max(8, 32 // max(1, itemsize))
    tile = max(align, (tile // align) * align)
    return min(tile, m_rows)


def layer_scale(x: jax.Array, gamma: jax.Array) -> jax.Array:
    """Compute gamma * x with gamma broadcast over the last axis of x."""
    assert x.shape[-1] == gamma.shape[0], "gamma dim must match last axis of x"
    orig_shape = x.shape
    d = orig_shape[-1]
    m = 1
    for s in orig_shape[:-1]:
        m *= s
    if m * d == 0:  # degenerate empty tensor
        return x

    # Lane-dense layout: with d < 128 every vreg would use only d of 128 lanes
    # and stores become masked partial stores (vst.msk).  When d divides 128
    # and the rows fold evenly, reshape so the lane axis is a full 128 and
    # pre-tile gamma accordingly.  Pure wrapper-side layout plumbing (the
    # reshape is a free row-major view; tiling gamma is O(128) work).
    if d < 128 and 128 % d == 0 and (m * d) % 128 == 0:
        lanes = 128
        reps = 128 // d
        m_rows = (m * d) // 128
        x2 = x.reshape(m_rows, lanes)
        gamma2 = jnp.tile(gamma, reps).reshape(1, lanes)
    else:
        lanes = d
        m_rows = m
        x2 = x.reshape(m_rows, lanes)
        gamma2 = gamma.reshape(1, lanes)

    tile_m = _choose_tile_rows(m_rows, lanes, x.dtype.itemsize)
    grid = (pl.cdiv(m_rows, tile_m),)

    x_bytes = m_rows * lanes * x.dtype.itemsize
    cost = pl.CostEstimate(
        flops=m_rows * lanes,
        transcendentals=0,
        bytes_accessed=2 * x_bytes + lanes * gamma2.dtype.itemsize,
    )

    out = pl.pallas_call(
        _layerscale_kernel,
        out_shape=jax.ShapeDtypeStruct((m_rows, lanes), x.dtype),
        grid_spec=pl.GridSpec(
            grid=grid,
            in_specs=[
                pl.BlockSpec((1, lanes), lambda i: (0, 0)),        # gamma (resident)
                pl.BlockSpec((tile_m, lanes), lambda i: (i, 0)),   # x row tiles
            ],
            out_specs=pl.BlockSpec((tile_m, lanes), lambda i: (i, 0)),
        ),
        compiler_params=pltpu.CompilerParams(
            dimension_semantics=("parallel",),   # shard rows across v7x's 2 TCs
            vmem_limit_bytes=32 * 1024 * 1024,
        ),
        cost_estimate=cost,
        input_output_aliases={1: 0},  # donate x's HBM buffer to the output
    )(gamma2, x2)

    return out.reshape(orig_shape)


if __name__ == "__main__":
    key = jax.random.PRNGKey(0)

    # Small shapes consistent with the module: tokens of hidden size `dim`.
    batch, seq, dim = 2, 8, 32
    init_value = 0.1  # nn.Parameter(init_value * torch.ones(dim))

    x = jax.random.normal(key, (batch, seq, dim), dtype=jnp.float32)
    gamma = init_value * jnp.ones((dim,), dtype=jnp.float32)

    y = layer_scale(x, gamma)
    y = jax.block_until_ready(y)

    # Reference check against plain JAX broadcasting (same semantics as torch).
    y_ref = gamma * x
    assert y.shape == x.shape
    assert jnp.allclose(y, y_ref, atol=1e-6, rtol=1e-6)

    # Exercise the d >= 128 / non-lane-dense fallback path.
    k2 = jax.random.PRNGKey(1)
    x_b = jax.random.normal(k2, (2, 8, 160), dtype=jnp.float32)
    g_b = 0.05 * jnp.ones((160,), dtype=jnp.float32)
    y_b = jax.block_until_ready(layer_scale(x_b, g_b))
    assert jnp.allclose(y_b, g_b * x_b, atol=1e-6, rtol=1e-6)

    # Exercise a bf16 activation with fp32 gamma (mixed-precision path).
    k3 = jax.random.PRNGKey(2)
    x_c = jax.random.normal(k3, (2, 8, 64), dtype=jnp.bfloat16)
    g_c = 0.1 * jnp.ones((64,), dtype=jnp.float32)
    y_c = jax.block_until_ready(layer_scale(x_c, g_c))
    y_c_ref = (x_c * g_c).astype(jnp.bfloat16)
    assert jnp.allclose(y_c.astype(jnp.float32), y_c_ref.astype(jnp.float32),
                        atol=1e-2, rtol=1e-2)

    print("KERNEL_OK")
</pallas_src>

<mosaic_0001>
module attributes {stable_mosaic.version = 11 : i64} {
  func.func @_layerscale_kernel(%arg0: i32, %arg1: memref<1x128xf32, #tpu.memory_space<vmem>>, %arg2: memref<4x128xf32, #tpu.memory_space<vmem>>, %arg3: memref<4x128xf32, #tpu.memory_space<vmem>>) attributes {dimension_semantics = [#tpu.dimension_semantics<parallel>], iteration_bounds = array<i64: 1>, scalar_prefetch = 0 : i64, scratch_operands = 0 : i64, tpu.core_type = #tpu.core_type<tc>, window_params = [{pipeline_mode = #tpu.pipeline_mode<synchronous>, transform_indices = @transform_0, window_bounds = array<i64: 1, 128>}, {transform_indices = @transform_1, window_bounds = array<i64: 4, 128>}, {transform_indices = @transform_2, window_bounds = array<i64: 4, 128>}]} {
    %c0 = arith.constant 0 : index
    %c0_0 = arith.constant 0 : index
    %0 = vector.load %arg2[%c0, %c0_0] : memref<4x128xf32, #tpu.memory_space<vmem>>, vector<4x128xf32>
    %c0_1 = arith.constant 0 : index
    %c0_2 = arith.constant 0 : index
    %1 = vector.load %arg1[%c0_1, %c0_2] : memref<1x128xf32, #tpu.memory_space<vmem>>, vector<1x128xf32>
    %2 = vector.broadcast %1 : vector<1x128xf32> to vector<4x128xf32>
    %3 = arith.mulf %0, %2 : vector<4x128xf32>
    %c0_3 = arith.constant 0 : index
    %c0_4 = arith.constant 0 : index
    %4 = vector.load %arg3[%c0_3, %c0_4] : memref<4x128xf32, #tpu.memory_space<vmem>>, vector<4x128xf32>
    tpu.vector_store %arg3[%c0_3, %c0_4], %3 {strides = array<i32>} : memref<4x128xf32, #tpu.memory_space<vmem>>, vector<4x128xf32>,
    return
  }
  func.func @transform_0(%arg0: i32) -> (i32, i32) {
    %c0_i32 = arith.constant 0 : i32
    %c0_i32_0 = arith.constant 0 : i32
    %c0_i32_1 = arith.constant 0 : i32
    return %c0_i32, %c0_i32_0 : i32, i32
  }
  func.func @transform_1(%arg0: i32) -> (i32, i32) {
    %c0_i32 = arith.constant 0 : i32
    %c0_i32_0 = arith.constant 0 : i32
    return %arg0, %c0_i32 : i32, i32
  }
  func.func @transform_2(%arg0: i32) -> (i32, i32) {
    %c0_i32 = arith.constant 0 : i32
    %c0_i32_0 = arith.constant 0 : i32
    return %arg0, %c0_i32 : i32, i32
  }
}

</mosaic_0001>

<bundles_post_ra>
// kernel: tpu_custom_call.1
= control target key start
LH: loop header
LB: loop body
LE: loop exit
PB: predicated region body
PF: predicated region fallthrough
CT: control target
= control target key end

     0   :  { %7 = vsyncpa [#allocation3], 0  ;;  %s122_s0 = inlined_call_operand.vmem [shape: f32[1,128], index: 0, kind: input, shape index: {}]   ;;  %s123_s1 = inlined_call_operand.hbm [shape: f32[4,128], index: 1, kind: input, shape index: {}, may-alias: {1,2}]   ;;  %s124_s2 = inlined_call_operand.hbm [shape: f32[4,128], index: 2, kind: output, shape index: {}, may-alias: {1,2}]  }
   0x1   :  { %8 = vsyncpa [#allocation4], 0  ;;  %s96_s9 = smov [#allocation2]  }
   0x2   :  { %s17_s10 = sshll.u32 %s96_s9, 4  ;;  %s18_s10 = int_to_ptr.vmem [resolvable:$true] %s17_s10 }
   0x3   :  { %s60_s11 = scalar_lea.vmem %s18_s10, 64  ;;  %p65_p1 = scmp.lt.s32.totalorder %s18_s10, %s18_s10 }
   0x4   :  { %p61_p0 = scmp.ne.s32.totalorder %s18_s10, %s60_s11  ;;  %p66_p2 = scmp.lt.s32.totalorder %s60_s11, %s60_s11 }
   0x6   :  { %p67_p3 = por %p66_p2, %p65_p1 }
   0x8   :  { %p68_p4 = pnand %p67_p3, %p61_p0 }
   0xa   :  { %71 = shalt.err (!%p68_p4)
}
   0xb   :  { %20 = dma.hbm_to_vmem [thread:$0]  %s123_s1, 64, %s18_s10, [#allocation3]  }
   0xc   :  { %92 = dma.done.wait [#allocation3], 64  }
   0xd   :  { %93 = vsyncadd [#allocation3], 4294967232  ;;  %s97_s14 = smov [#allocation5]   ;;  %v24_v0 = vld [vmem:[#allocation2] sm:$0xf] }
   0xe   :  { %s40_s15 = sshll.u32 %s97_s14, 4  ;;  %v49_v1 = vld [vmem:[%s122_s0] ss:$0 sm:$0xff]  ;;  %s41_s15 = int_to_ptr.vmem [resolvable:$true] %s40_s15 }
   0xf   :  { %v32_v2 = vmul.f32 %v49_v1, %v24_v0  ;;  %s72_s18 = scalar_lea.vmem %s41_s15, 64  ;;  %p77_p6 = scmp.lt.s32.totalorder %s41_s15, %s41_s15 }
  0x10   :  { %p73_p5 = scmp.ne.s32.totalorder %s41_s15, %s72_s18  ;;  %p78_p7 = scmp.lt.s32.totalorder %s72_s18, %s72_s18 }
  0x11   :  { %33 = vst [vmem:[#allocation5] sm:$0xf] %v32_v2 }
  0x12   :  { %p79_p8 = por %p78_p7, %p77_p6 }
  0x14   :  { %p80_p9 = pnand %p79_p8, %p73_p5 }
  0x16   :  { %83 = shalt.err (!%p80_p9)
}
  0x17   :  { %43 = dma.vmem_to_hbm [thread:$0]  %s41_s15, 64, %s124_s2, [#allocation4]  }
  0x18   :  { %94 = dma.done.wait [#allocation4], 64  }
  0x19   :  { %95 = vsyncadd [#allocation4], 4294967232 }
  0x1a   :  { %47 = vsyncpa [#allocation3], 1 }
  0x1b   :  { %48 = vsyncpa [#allocation4], 1 }

</bundles_post_ra>
